<compile_context>
chip_gen: v6e
topology: v6e:2x2x1
jax: 0.10.0
libtpu: 0.0.40
codegen_flags: <defaults>
</compile_context>

<pallas_src>
import functools

import jax
import jax.numpy as jnp
from jax.experimental import pallas as pl
from jax.experimental.pallas import tpu as pltpu


# ------------------------------ helpers --------------------------------------


def _layernorm(v, w, b, eps=1e-5):
    mu = jnp.mean(v, axis=-1, keepdims=True)
    var = jnp.mean((v - mu) ** 2, axis=-1, keepdims=True)
    return (v - mu) * jax.lax.rsqrt(var + eps) * w + b


def _tpu_vmem_capacity_bytes():
    try:
        return int(pltpu.get_tpu_info().vmem_capacity_bytes)
    except Exception:
        return 64 << 20          # conservative fallback (v7x-sized)


def _row_tile(n_rows, max_tile):
    """Largest row tile <= max_tile dividing n_rows, multiple of 8 (or full)."""
    if n_rows <= max_tile:
        return n_rows
    for t in range(max_tile, 7, -1):
        if n_rows % t == 0 and t % 8 == 0:
            return t
    # TODO(synk): pad the token axis instead of falling back to the full
    # extent when n_rows has no multiple-of-8 divisor <= max_tile.
    return n_rows


def _kv_tile(seq_len, max_tile=512):
    """Largest multiple-of-128 KV tile <= max_tile dividing L, else full L."""
    if seq_len <= max_tile:
        return seq_len
    for t in range(max_tile - max_tile % 128, 127, -128):
        if seq_len % t == 0:
            return t
    return seq_len


def _const_spec(arr):
    """Full-array, grid-invariant block; single-buffered (never changes)."""
    zeros = (0,) * arr.ndim

    def idx(*_):
        return zeros

    return pl.BlockSpec(arr.shape, idx, pipeline_mode=pl.Buffered(1))


# ------------------------------ kernels ---------------------------------------


def _ln_qkv_kernel(scale, x_ref, qa_ref, ka_ref, n1w_ref, n1b_ref,
                   wq_ref, wk_ref, wv_ref, q_ref, k_ref, v_ref):
    """LayerNorm1 + Q/K/V projections over one (1, tl, C) token tile.

    1/sqrt(dh) is folded into q here (O(M*C) VALU work instead of O(L*L) on
    the score matrix).  MXU inputs bf16, accumulation f32.
    """
    xn = _layernorm(x_ref[0], n1w_ref[0], n1b_ref[0])
    qin = ((xn + qa_ref[0]) * scale).astype(jnp.bfloat16)
    kin = (xn + ka_ref[0]).astype(jnp.bfloat16)
    vin = xn.astype(jnp.bfloat16)
    q_ref[0] = jnp.dot(qin, wq_ref[...],
                       preferred_element_type=jnp.float32).astype(q_ref.dtype)
    k_ref[0] = jnp.dot(kin, wk_ref[...],
                       preferred_element_type=jnp.float32).astype(k_ref.dtype)
    v_ref[0] = jnp.dot(vin, wv_ref[...],
                       preferred_element_type=jnp.float32).astype(v_ref.dtype)


def _attn_kernel(num_heads, x_ref, q_ref, k_ref, v_ref, apos_ref, wp_ref,
                 bp_ref, o_ref, m_sc, l_sc, acc_sc):
    """Per-batch attention core, KV-blocked (online softmax), all heads
    batched in single einsums, output projection + residual fused in."""
    H = num_heads
    _, L, C = q_ref.shape
    dh = C // H
    tkv = k_ref.shape[1]
    kv = pl.program_id(1)

    @pl.when(kv == 0)
    def _():
        m_sc[...] = jnp.full_like(m_sc, -jnp.inf)
        l_sc[...] = jnp.zeros_like(l_sc)
        acc_sc[...] = jnp.zeros_like(acc_sc)

    def split_heads(ref, n):
        # (n, C) -> (n, H, dh) -> (H, n, dh); XLU relayout, MXU stays busy.
        return pltpu.einshape("mhd->hmd", ref[0].reshape(n, H, dh))

    qh = split_heads(q_ref, L)        # (H, L, dh) bf16, 1/sqrt(dh) folded in
    kh = split_heads(k_ref, tkv)      # (H, tkv, dh) bf16
    vh = split_heads(v_ref, tkv)      # (H, tkv, dh) bf16

    s = jnp.einsum("hqd,hkd->hqk", qh, kh,
                   preferred_element_type=jnp.float32)
    s = s + apos_ref[0].astype(jnp.float32)          # bf16 attn_pos block

    m_new = jnp.maximum(m_sc[...], jnp.max(s, axis=-1, keepdims=True))
    alpha = jnp.exp(m_sc[...] - m_new)
    p = jnp.exp(s - m_new)
    l_sc[...] = alpha * l_sc[...] + jnp.sum(p, axis=-1, keepdims=True)
    acc_sc[...] = alpha * acc_sc[...] + jnp.einsum(
        "hqk,hkd->hqd", p.astype(vh.dtype), vh,
        preferred_element_type=jnp.float32)
    m_sc[...] = m_new

    @pl.when(kv == pl.num_programs(1) - 1)
    def _():
        o = acc_sc[...] * pl.reciprocal(l_sc[...], approx=True)   # (H, L, dh)
        om = pltpu.einshape("hmd->mhd", o).reshape(L, C).astype(jnp.bfloat16)
        proj = jnp.dot(om, wp_ref[...],
                       preferred_element_type=jnp.float32) + bp_ref[0]
        o_ref[0] = (x_ref[0] + proj).astype(o_ref.dtype)   # lane-dense (L, C)
    # TODO(synk): for very long sequences also tile the q axis
    # (grid (B, q_tiles, kv_tiles)) so the (H, tq, tkv) score block stays small.


def _ln2_mlp_kernel(x1_ref, n2w_ref, n2b_ref, w1_ref, b1_ref, w2_ref, b2_ref,
                    o_ref):
    """LayerNorm2 + MLP(GELU) + residual over one (tm, C) token tile."""
    x1 = x1_ref[...]
    xn2 = _layernorm(x1, n2w_ref[0], n2b_ref[0])
    h = jnp.dot(xn2.astype(jnp.bfloat16), w1_ref[...],
                preferred_element_type=jnp.float32) + b1_ref[0]
    h = jax.nn.gelu(h, approximate=False)      # exact erf = nn.GELU default
    mlp = jnp.dot(h.astype(jnp.bfloat16), w2_ref[...],
                  preferred_element_type=jnp.float32) + b2_ref[0]
    o_ref[...] = (x1 + mlp).astype(o_ref.dtype)


# ------------------------------ wrapper ---------------------------------------


def self_attention_block(x, q_ape, k_ape, attn_pos, params, num_heads):
    B, L, C = x.shape
    H = num_heads
    assert C % H == 0
    dh = C // H
    BL = B * L
    scale = dh ** (-0.5)
    bf16 = jnp.bfloat16

    assert q_ape.shape[0] in (1, B) and q_ape.shape[1:] == (L, C)
    assert k_ape.shape[0] in (1, B) and k_ape.shape[1:] == (L, C)
    assert attn_pos.shape[0] in (1, B) and attn_pos.shape[1:] == (H, L, L)

    # ---- hardware-aware budgets (smaller tiles / scoped VMEM on 64 MiB parts)
    vmem_cap = _tpu_vmem_capacity_bytes()
    max_tile = 256 if vmem_cap <= (64 << 20) else 512
    vmem_limit = max(32 << 20, min((vmem_cap * 3) // 4, 100 << 20))

    # bf16 copies of the GEMM weights (halves DMA bytes, full-rate MXU;
    # accumulation inside the kernels stays f32).
    wq = params["wq"].astype(bf16)
    wk = params["wk"].astype(bf16)
    wv = params["wv"].astype(bf16)
    wp = params["wp"].astype(bf16)
    w1 = params["w1"].astype(bf16)
    w2 = params["w2"].astype(bf16)
    apos = attn_pos.astype(bf16)     # deliberate numerics change (see header)

    # ---- stage 1: LN1 + QKV projections, grid (B, L-tiles); q_ape/k_ape are
    # blocked straight from their (1 or B, L, C) storage -> no broadcast copy.
    tl = _row_tile(L, max_tile)
    n_lt = L // tl
    tok_spec = pl.BlockSpec((1, tl, C), lambda b, i: (b, i, 0))
    qa_spec = pl.BlockSpec(
        (1, tl, C),
        (lambda b, i: (b, i, 0)) if q_ape.shape[0] == B else (lambda b, i: (0, i, 0)))
    ka_spec = pl.BlockSpec(
        (1, tl, C),
        (lambda b, i: (b, i, 0)) if k_ape.shape[0] == B else (lambda b, i: (0, i, 0)))

    qkv_fn = pl.pallas_call(
        functools.partial(_ln_qkv_kernel, scale),
        out_shape=(jax.ShapeDtypeStruct((B, L, C), bf16),
                   jax.ShapeDtypeStruct((B, L, C), bf16),
                   jax.ShapeDtypeStruct((B, L, C), bf16)),
        grid_spec=pltpu.PrefetchScalarGridSpec(
            num_scalar_prefetch=0,
            grid=(B, n_lt),
            in_specs=[
                tok_spec, qa_spec, ka_spec,
                _const_spec(params["n1w"]), _const_spec(params["n1b"]),
                _const_spec(wq), _const_spec(wk), _const_spec(wv),
            ],
            out_specs=[tok_spec, tok_spec, tok_spec],
        ),
        compiler_params=pltpu.CompilerParams(
            dimension_semantics=("parallel", "parallel"),
            vmem_limit_bytes=vmem_limit),
    )
    q3, k3, v3 = qkv_fn(x, q_ape, k_ape, params["n1w"], params["n1b"],
                        wq, wk, wv)

    # ---- stage 2: KV-blocked attention + fused output projection + residual.
    tkv = _kv_tile(L)
    n_kv = L // tkv
    apos_map = ((lambda b, kv: (b, 0, 0, kv)) if attn_pos.shape[0] == B
                else (lambda b, kv: (0, 0, 0, kv)))
    res_spec = pl.BlockSpec((1, L, C), lambda b, kv: (b, 0, 0))

    attn_fn = pl.pallas_call(
        functools.partial(_attn_kernel, H),
        out_shape=jax.ShapeDtypeStruct((B, L, C), x.dtype),
        grid_spec=pltpu.PrefetchScalarGridSpec(
            num_scalar_prefetch=0,
            grid=(B, n_kv),
            in_specs=[
                res_spec,                                          # residual x
                res_spec,                                          # q (scaled)
                pl.BlockSpec((1, tkv, C), lambda b, kv: (b, kv, 0)),   # k
                pl.BlockSpec((1, tkv, C), lambda b, kv: (b, kv, 0)),   # v
                pl.BlockSpec((1, H, L, tkv), apos_map),            # attn_pos
                _const_spec(wp), _const_spec(params["bp"]),
            ],
            out_specs=res_spec,
            scratch_shapes=[
                pltpu.VMEM((H, L, 1), jnp.float32),    # running max
                pltpu.VMEM((H, L, 1), jnp.float32),    # running denom
                pltpu.VMEM((H, L, dh), jnp.float32),   # running numerator
            ],
        ),
        compiler_params=pltpu.CompilerParams(
            dimension_semantics=("parallel", "arbitrary"),
            vmem_limit_bytes=vmem_limit),
    )
    x1 = attn_fn(x, q3, k3, v3, apos, wp, params["bp"])

    # ---- stage 3: LN2 + MLP + residual, row-tiled over all B*L tokens.
    tm = _row_tile(BL, max_tile)
    n_row = BL // tm
    x1f = x1.reshape(BL, C)
    row_spec = pl.BlockSpec((tm, C), lambda i: (i, 0))

    tail_fn = pl.pallas_call(
        _ln2_mlp_kernel,
        out_shape=jax.ShapeDtypeStruct((BL, C), x.dtype),
        grid_spec=pltpu.PrefetchScalarGridSpec(
            num_scalar_prefetch=0,
            grid=(n_row,),
            in_specs=[
                row_spec,
                _const_spec(params["n2w"]), _const_spec(params["n2b"]),
                _const_spec(w1), _const_spec(params["b1"]),
                _const_spec(w2), _const_spec(params["b2"]),
            ],
            out_specs=row_spec,
        ),
        compiler_params=pltpu.CompilerParams(
            dimension_semantics=("parallel",),
            vmem_limit_bytes=vmem_limit),
    )
    y = tail_fn(x1f, params["n2w"], params["n2b"],
                w1, params["b1"], w2, params["b2"])
    return y.reshape(B, L, C)


# ------------------------------ pure-JAX reference ----------------------------


def reference(x, q_ape, k_ape, attn_pos, p, num_heads, mirror_bf16=False):
    """Reference forward.

    mirror_bf16=False : faithful f32 forward of the PyTorch module.
    mirror_bf16=True  : mirrors the kernel's bf16 MXU inputs / bf16 stage
                        intermediates / bf16 attn_pos (f32 accumulation).
    """
    B, L, C = x.shape
    H = num_heads
    dh = C // H
    scale = dh ** (-0.5)
    f32 = jnp.float32

    def cast(a):
        return a.astype(jnp.bfloat16) if mirror_bf16 else a

    def mm(a, b):
        return jnp.dot(cast(a), cast(b), preferred_element_type=f32)

    def ln(v, w, b):
        mu = jnp.mean(v, axis=-1, keepdims=True)
        var = jnp.mean((v - mu) ** 2, axis=-1, keepdims=True)
        return (v - mu) * jax.lax.rsqrt(var + 1e-5) * w[0] + b[0]

    xn = ln(x, p["n1w"], p["n1b"])
    # scale folded into q (mathematically identical to scaling the scores)
    q = mm((xn + q_ape) * scale, p["wq"])
    k = mm(xn + k_ape, p["wk"])
    v = mm(xn, p["wv"])
    if mirror_bf16:                 # kernel stores q/k/v as bf16 between stages
        q, k, v = cast(q), cast(k), cast(v)
    q = q.reshape(B, L, H, dh).transpose(0, 2, 1, 3)
    k = k.reshape(B, L, H, dh).transpose(0, 2, 1, 3)
    v = v.reshape(B, L, H, dh).transpose(0, 2, 1, 3)
    ap = (attn_pos.astype(jnp.bfloat16).astype(f32) if mirror_bf16
          else attn_pos)
    s = jnp.einsum("bhqd,bhkd->bhqk", cast(q), cast(k),
                   preferred_element_type=f32) + ap
    a = jax.nn.softmax(s, axis=-1)
    o = jnp.einsum("bhqk,bhkd->bhqd", cast(a), cast(v),
                   preferred_element_type=f32)
    o = o.transpose(0, 2, 1, 3).reshape(B, L, C)
    if mirror_bf16:                 # kernel projects from a bf16 attention out
        o = cast(o)
    o = mm(o, p["wp"]) + p["bp"][0]
    x1 = x + o
    xn2 = ln(x1, p["n2w"], p["n2b"])
    h = jax.nn.gelu(mm(xn2, p["w1"]) + p["b1"][0], approximate=False)
    return x1 + mm(h, p["w2"]) + p["b2"][0]


# ------------------------------ main -------------------------------------------


if __name__ == "__main__":
    B, L, C = 2, 16, 32
    num_heads = 4
    mlp_hidden = int(C * 4.0)

    key = jax.random.PRNGKey(0)
    ks = jax.random.split(key, 20)

    def rnd(k, shape, s=0.1):
        return jax.random.normal(k, shape, dtype=jnp.float32) * s

    x = rnd(ks[0], (B, L, C), 1.0)
    q_ape = rnd(ks[1], (1, L, C), 0.5)
    k_ape = rnd(ks[2], (1, L, C), 0.5)
    attn_pos = rnd(ks[3], (1, num_heads, L, L), 0.5)

    # PyTorch nn.Linear weights pre-transposed to (in, out); qkv_bias=False.
    params = {
        "n1w": 1.0 + rnd(ks[13], (1, C), 0.1),
        "n1b": rnd(ks[14], (1, C), 0.1),
        "wq": rnd(ks[4], (C, C)),
        "wk": rnd(ks[5], (C, C)),
        "wv": rnd(ks[6], (C, C)),
        "wp": rnd(ks[7], (C, C)),
        "bp": rnd(ks[8], (1, C)),
        "n2w": 1.0 + rnd(ks[15], (1, C), 0.1),
        "n2b": rnd(ks[16], (1, C), 0.1),
        "w1": rnd(ks[9], (C, mlp_hidden)),
        "b1": rnd(ks[10], (1, mlp_hidden)),
        "w2": rnd(ks[11], (mlp_hidden, C)),
        "b2": rnd(ks[12], (1, C)),
    }

    out = jax.block_until_ready(
        self_attention_block(x, q_ape, k_ape, attn_pos, params, num_heads))

    ref_bf16 = jax.block_until_ready(
        reference(x, q_ape, k_ape, attn_pos, params, num_heads,
                  mirror_bf16=True))
    ref_f32 = jax.block_until_ready(
        reference(x, q_ape, k_ape, attn_pos, params, num_heads,
                  mirror_bf16=False))

    assert out.shape == (B, L, C)
    err_b = float(jnp.max(jnp.abs(out - ref_bf16)))
    err_f = float(jnp.max(jnp.abs(out - ref_f32)))
    # Tight check vs a reference that mirrors the kernel's bf16 MXU inputs.
    assert jnp.allclose(out, ref_bf16, atol=1e-2, rtol=1e-2), err_b
    # Looser sanity check vs the pure-f32 (PyTorch-semantics) reference;
    # the gap is bf16 matmul/attn_pos rounding + approx softmax reciprocal.
    assert jnp.allclose(out, ref_f32, atol=4e-2, rtol=4e-2), err_f

    print("KERNEL_OK")
</pallas_src>

<mosaic_0001>
module attributes {stable_mosaic.version = 11 : i64} {
  func.func @_ln_qkv_kernel(%arg0: i32, %arg1: i32, %arg2: memref<1x16x32xf32, #tpu.memory_space<vmem>>, %arg3: memref<1x16x32xf32, #tpu.memory_space<vmem>>, %arg4: memref<1x16x32xf32, #tpu.memory_space<vmem>>, %arg5: memref<1x32xf32, #tpu.memory_space<vmem>>, %arg6: memref<1x32xf32, #tpu.memory_space<vmem>>, %arg7: memref<32x32xbf16, #tpu.memory_space<vmem>>, %arg8: memref<32x32xbf16, #tpu.memory_space<vmem>>, %arg9: memref<32x32xbf16, #tpu.memory_space<vmem>>, %arg10: memref<1x16x32xbf16, #tpu.memory_space<vmem>>, %arg11: memref<1x16x32xbf16, #tpu.memory_space<vmem>>, %arg12: memref<1x16x32xbf16, #tpu.memory_space<vmem>>) attributes {dimension_semantics = [#tpu.dimension_semantics<parallel>, #tpu.dimension_semantics<parallel>], iteration_bounds = array<i64: 2, 1>, scalar_prefetch = 0 : i64, scratch_operands = 0 : i64, tpu.core_type = #tpu.core_type<tc>, window_params = [{transform_indices = @transform_0, window_bounds = array<i64: 1, 16, 32>}, {transform_indices = @transform_1, window_bounds = array<i64: 1, 16, 32>}, {transform_indices = @transform_2, window_bounds = array<i64: 1, 16, 32>}, {pipeline_mode = #tpu.pipeline_mode<synchronous>, transform_indices = @transform_3, window_bounds = array<i64: 1, 32>}, {pipeline_mode = #tpu.pipeline_mode<synchronous>, transform_indices = @transform_4, window_bounds = array<i64: 1, 32>}, {pipeline_mode = #tpu.pipeline_mode<synchronous>, transform_indices = @transform_5, window_bounds = array<i64: 32, 32>}, {pipeline_mode = #tpu.pipeline_mode<synchronous>, transform_indices = @transform_6, window_bounds = array<i64: 32, 32>}, {pipeline_mode = #tpu.pipeline_mode<synchronous>, transform_indices = @transform_7, window_bounds = array<i64: 32, 32>}, {transform_indices = @transform_8, window_bounds = array<i64: 1, 16, 32>}, {transform_indices = @transform_9, window_bounds = array<i64: 1, 16, 32>}, {transform_indices = @transform_10, window_bounds = array<i64: 1, 16, 32>}]} {
    %c0 = arith.constant 0 : index
    %c0_0 = arith.constant 0 : index
    %c0_1 = arith.constant 0 : index
    %0 = vector.load %arg2[%c0, %c0_0, %c0_1] : memref<1x16x32xf32, #tpu.memory_space<vmem>>, vector<1x16x32xf32>
    %1 = vector.shape_cast %0 : vector<1x16x32xf32> to vector<16x32xf32>
    %c0_2 = arith.constant 0 : index
    %c0_3 = arith.constant 0 : index
    %2 = vector.load %arg5[%c0_2, %c0_3] : memref<1x32xf32, #tpu.memory_space<vmem>>, vector<1x32xf32>
    %3 = vector.shape_cast %2 : vector<1x32xf32> to vector<32xf32>
    %c0_4 = arith.constant 0 : index
    %c0_5 = arith.constant 0 : index
    %4 = vector.load %arg6[%c0_4, %c0_5] : memref<1x32xf32, #tpu.memory_space<vmem>>, vector<1x32xf32>
    %5 = vector.shape_cast %4 : vector<1x32xf32> to vector<32xf32>
    %cst = arith.constant dense<0.000000e+00> : vector<16xf32>
    %6 = vector.multi_reduction <add>, %1, %cst [1] : vector<16x32xf32> to vector<16xf32>
    %7 = vector.shape_cast %6 : vector<16xf32> to vector<16x1xf32>
    %cst_6 = arith.constant 3.200000e+01 : f32
    %8 = vector.broadcast %cst_6 : f32 to vector<16x1xf32>
    %9 = arith.divf %7, %8 : vector<16x1xf32>
    %10 = vector.broadcast %9 : vector<16x1xf32> to vector<16x32xf32>
    %11 = arith.subf %1, %10 : vector<16x32xf32>
    %12 = arith.mulf %11, %11 : vector<16x32xf32>
    %cst_7 = arith.constant dense<0.000000e+00> : vector<16xf32>
    %13 = vector.multi_reduction <add>, %12, %cst_7 [1] : vector<16x32xf32> to vector<16xf32>
    %14 = vector.shape_cast %13 : vector<16xf32> to vector<16x1xf32>
    %cst_8 = arith.constant 3.200000e+01 : f32
    %15 = vector.broadcast %cst_8 : f32 to vector<16x1xf32>
    %16 = arith.divf %14, %15 : vector<16x1xf32>
    %17 = vector.broadcast %9 : vector<16x1xf32> to vector<16x32xf32>
    %18 = arith.subf %1, %17 : vector<16x32xf32>
    %cst_9 = arith.constant 9.99999974E-6 : f32
    %19 = vector.broadcast %cst_9 : f32 to vector<16x1xf32>
    %20 = arith.addf %16, %19 : vector<16x1xf32>
    %21 = math.rsqrt %20 : vector<16x1xf32>
    %22 = vector.broadcast %21 : vector<16x1xf32> to vector<16x32xf32>
    %23 = arith.mulf %18, %22 : vector<16x32xf32>
    %24 = vector.shape_cast %3 : vector<32xf32> to vector<1x32xf32>
    %25 = vector.broadcast %24 : vector<1x32xf32> to vector<16x32xf32>
    %26 = arith.mulf %23, %25 : vector<16x32xf32>
    %27 = vector.shape_cast %5 : vector<32xf32> to vector<1x32xf32>
    %28 = vector.broadcast %27 : vector<1x32xf32> to vector<16x32xf32>
    %29 = arith.addf %26, %28 : vector<16x32xf32>
    %c0_10 = arith.constant 0 : index
    %c0_11 = arith.constant 0 : index
    %c0_12 = arith.constant 0 : index
    %30 = vector.load %arg3[%c0_10, %c0_11, %c0_12] : memref<1x16x32xf32, #tpu.memory_space<vmem>>, vector<1x16x32xf32>
    %31 = vector.shape_cast %30 : vector<1x16x32xf32> to vector<16x32xf32>
    %32 = arith.addf %29, %31 : vector<16x32xf32>
    %cst_13 = arith.constant 0.353553385 : f32
    %33 = vector.broadcast %cst_13 : f32 to vector<16x32xf32>
    %34 = arith.mulf %32, %33 : vector<16x32xf32>
    %35 = arith.truncf %34 : vector<16x32xf32> to vector<16x32xbf16>
    %c0_14 = arith.constant 0 : index
    %c0_15 = arith.constant 0 : index
    %c0_16 = arith.constant 0 : index
    %36 = vector.load %arg4[%c0_14, %c0_15, %c0_16] : memref<1x16x32xf32, #tpu.memory_space<vmem>>, vector<1x16x32xf32>
    %37 = vector.shape_cast %36 : vector<1x16x32xf32> to vector<16x32xf32>
    %38 = arith.addf %29, %37 : vector<16x32xf32>
    %39 = arith.truncf %38 : vector<16x32xf32> to vector<16x32xbf16>
    %40 = arith.truncf %29 : vector<16x32xf32> to vector<16x32xbf16>
    %c0_17 = arith.constant 0 : index
    %c0_18 = arith.constant 0 : index
    %41 = vector.load %arg7[%c0_17, %c0_18] : memref<32x32xbf16, #tpu.memory_space<vmem>>, vector<32x32xbf16>
    %cst_19 = arith.constant dense<0.000000e+00> : vector<16x32xf32>
    %42 = tpu.matmul %35, %41, %cst_19 {dimension_numbers = #tpu.dot_dimension_numbers<[1], [0], [0], [1], [0, 0, 1, 1], [], []>} : vector<16x32xbf16>, vector<32x32xbf16>, vector<16x32xf32> -> vector<16x32xf32>
    %43 = arith.truncf %42 : vector<16x32xf32> to vector<16x32xbf16>
    %c0_20 = arith.constant 0 : index
    %c0_21 = arith.constant 0 : index
    %c0_22 = arith.constant 0 : index
    %44 = vector.load %arg10[%c0_20, %c0_21, %c0_22] : memref<1x16x32xbf16, #tpu.memory_space<vmem>>, vector<1x16x32xbf16>
    %45 = vector.shape_cast %44 : vector<1x16x32xbf16> to vector<16x32xbf16>
    %46 = vector.shape_cast %43 : vector<16x32xbf16> to vector<1x16x32xbf16>
    tpu.vector_store %arg10[%c0_20, %c0_21, %c0_22], %46 {strides = array<i32>} : memref<1x16x32xbf16, #tpu.memory_space<vmem>>, vector<1x16x32xbf16>,
    %c0_23 = arith.constant 0 : index
    %c0_24 = arith.constant 0 : index
    %47 = vector.load %arg8[%c0_23, %c0_24] : memref<32x32xbf16, #tpu.memory_space<vmem>>, vector<32x32xbf16>
    %cst_25 = arith.constant dense<0.000000e+00> : vector<16x32xf32>
    %48 = tpu.matmul %39, %47, %cst_25 {dimension_numbers = #tpu.dot_dimension_numbers<[1], [0], [0], [1], [0, 0, 1, 1], [], []>} : vector<16x32xbf16>, vector<32x32xbf16>, vector<16x32xf32> -> vector<16x32xf32>
    %49 = arith.truncf %48 : vector<16x32xf32> to vector<16x32xbf16>
    %c0_26 = arith.constant 0 : index
    %c0_27 = arith.constant 0 : index
    %c0_28 = arith.constant 0 : index
    %50 = vector.load %arg11[%c0_26, %c0_27, %c0_28] : memref<1x16x32xbf16, #tpu.memory_space<vmem>>, vector<1x16x32xbf16>
    %51 = vector.shape_cast %50 : vector<1x16x32xbf16> to vector<16x32xbf16>
    %52 = vector.shape_cast %49 : vector<16x32xbf16> to vector<1x16x32xbf16>
    tpu.vector_store %arg11[%c0_26, %c0_27, %c0_28], %52 {strides = array<i32>} : memref<1x16x32xbf16, #tpu.memory_space<vmem>>, vector<1x16x32xbf16>,
    %c0_29 = arith.constant 0 : index
    %c0_30 = arith.constant 0 : index
    %53 = vector.load %arg9[%c0_29, %c0_30] : memref<32x32xbf16, #tpu.memory_space<vmem>>, vector<32x32xbf16>
    %cst_31 = arith.constant dense<0.000000e+00> : vector<16x32xf32>
    %54 = tpu.matmul %40, %53, %cst_31 {dimension_numbers = #tpu.dot_dimension_numbers<[1], [0], [0], [1], [0, 0, 1, 1], [], []>} : vector<16x32xbf16>, vector<32x32xbf16>, vector<16x32xf32> -> vector<16x32xf32>
    %55 = arith.truncf %54 : vector<16x32xf32> to vector<16x32xbf16>
    %c0_32 = arith.constant 0 : index
    %c0_33 = arith.constant 0 : index
    %c0_34 = arith.constant 0 : index
    %56 = vector.load %arg12[%c0_32, %c0_33, %c0_34] : memref<1x16x32xbf16, #tpu.memory_space<vmem>>, vector<1x16x32xbf16>
    %57 = vector.shape_cast %56 : vector<1x16x32xbf16> to vector<16x32xbf16>
    %58 = vector.shape_cast %55 : vector<16x32xbf16> to vector<1x16x32xbf16>
    tpu.vector_store %arg12[%c0_32, %c0_33, %c0_34], %58 {strides = array<i32>} : memref<1x16x32xbf16, #tpu.memory_space<vmem>>, vector<1x16x32xbf16>,
    return
  }
  func.func @transform_0(%arg0: i32, %arg1: i32) -> (i32, i32, i32) {
    %c0_i32 = arith.constant 0 : i32
    %c0_i32_0 = arith.constant 0 : i32
    return %arg0, %arg1, %c0_i32 : i32, i32, i32
  }
  func.func @transform_1(%arg0: i32, %arg1: i32) -> (i32, i32, i32) {
    %c0_i32 = arith.constant 0 : i32
    %c0_i32_0 = arith.constant 0 : i32
    %c0_i32_1 = arith.constant 0 : i32
    return %c0_i32, %arg1, %c0_i32_0 : i32, i32, i32
  }
  func.func @transform_2(%arg0: i32, %arg1: i32) -> (i32, i32, i32) {
    %c0_i32 = arith.constant 0 : i32
    %c0_i32_0 = arith.constant 0 : i32
    %c0_i32_1 = arith.constant 0 : i32
    return %c0_i32, %arg1, %c0_i32_0 : i32, i32, i32
  }
  func.func @transform_3(%arg0: i32, %arg1: i32) -> (i32, i32) {
    %c0_i32 = arith.constant 0 : i32
    %c0_i32_0 = arith.constant 0 : i32
    %c0_i32_1 = arith.constant 0 : i32
    return %c0_i32, %c0_i32_0 : i32, i32
  }
  func.func @transform_4(%arg0: i32, %arg1: i32) -> (i32, i32) {
    %c0_i32 = arith.constant 0 : i32
    %c0_i32_0 = arith.constant 0 : i32
    %c0_i32_1 = arith.constant 0 : i32
    return %c0_i32, %c0_i32_0 : i32, i32
  }
  func.func @transform_5(%arg0: i32, %arg1: i32) -> (i32, i32) {
    %c0_i32 = arith.constant 0 : i32
    %c0_i32_0 = arith.constant 0 : i32
    %c0_i32_1 = arith.constant 0 : i32
    return %c0_i32, %c0_i32_0 : i32, i32
  }
  func.func @transform_6(%arg0: i32, %arg1: i32) -> (i32, i32) {
    %c0_i32 = arith.constant 0 : i32
    %c0_i32_0 = arith.constant 0 : i32
    %c0_i32_1 = arith.constant 0 : i32
    return %c0_i32, %c0_i32_0 : i32, i32
  }
  func.func @transform_7(%arg0: i32, %arg1: i32) -> (i32, i32) {
    %c0_i32 = arith.constant 0 : i32
    %c0_i32_0 = arith.constant 0 : i32
    %c0_i32_1 = arith.constant 0 : i32
    return %c0_i32, %c0_i32_0 : i32, i32
  }
  func.func @transform_8(%arg0: i32, %arg1: i32) -> (i32, i32, i32) {
    %c0_i32 = arith.constant 0 : i32
    %c0_i32_0 = arith.constant 0 : i32
    return %arg0, %arg1, %c0_i32 : i32, i32, i32
  }
  func.func @transform_9(%arg0: i32, %arg1: i32) -> (i32, i32, i32) {
    %c0_i32 = arith.constant 0 : i32
    %c0_i32_0 = arith.constant 0 : i32
    return %arg0, %arg1, %c0_i32 : i32, i32, i32
  }
  func.func @transform_10(%arg0: i32, %arg1: i32) -> (i32, i32, i32) {
    %c0_i32 = arith.constant 0 : i32
    %c0_i32_0 = arith.constant 0 : i32
    return %arg0, %arg1, %c0_i32 : i32, i32, i32
  }
}

</mosaic_0001>

<bundles_post_ra>
// kernel: tpu_custom_call.1
= control target key start
LH: loop header
LB: loop body
LE: loop exit
PB: predicated region body
PF: predicated region fallthrough
CT: control target
= control target key end

     0   :  { %s2011_s0 = inlined_call_operand.hbm [shape: f32[2,16,32], index: 0, kind: input, shape index: {}]   ;;  %s2012_s1 = inlined_call_operand.hbm [shape: f32[1,16,32], index: 1, kind: input, shape index: {}]   ;;  %s2013_s2 = inlined_call_operand.hbm [shape: f32[1,16,32], index: 2, kind: input, shape index: {}]   ;;  %s2014_s3 = inlined_call_operand.vmem [shape: f32[1,32], index: 3, kind: input, shape index: {}]   ;;  %s2015_s4 = inlined_call_operand.vmem [shape: f32[1,32], index: 4, kind: input, shape index: {}]   ;;  %s2016_s5 = inlined_call_operand.hbm [shape: bf16[32,32], index: 5, kind: input, shape index: {}]   ;;  %s2017_s6 = inlined_call_operand.hbm [shape: bf16[32,32], index: 6, kind: input, shape index: {}]   ;;  %s2018_s7 = inlined_call_operand.hbm [shape: bf16[32,32], index: 7, kind: input, shape index: {}]   ;;  %s2019_s8 = inlined_call_operand.hbm [shape: bf16[2,16,32], index: 8, kind: output, shape index: {0}]   ;;  %s2020_s9 = inlined_call_operand.hbm [shape: bf16[2,16,32], index: 9, kind: output, shape index: {1}]   ;;  %s2021_s10 = inlined_call_operand.hbm [shape: bf16[2,16,32], index: 10, kind: output, shape index: {2}]  }
   0x1   :  { %2031 = sst [smem:[#allocation27_spill]] %s2012_s1 }
   0x2   :  { %2032 = sst [smem:[#allocation28_spill]] %s2013_s2 }
   0x3   :  { %2033 = sst [smem:[#allocation29_spill]] %s2016_s5 }
   0x4   :  { %2034 = sst [smem:[#allocation30_spill]] %s2017_s6 }
   0x5   :  { %2035 = sst [smem:[#allocation31_spill]] %s2018_s7 }
   0x6   :  { %16 = vsyncpa [#allocation3], 0 }
   0x7   :  { %18 = vsyncpa [#allocation3 + $0x1], 0 }
   0x8   :  { %19 = vsyncpa [#allocation6], 0 }
   0x9   :  { %20 = vsyncpa [#allocation9], 0 }
   0xa   :  { %21 = vsyncpa [#allocation12], 0 }
   0xb   :  { %22 = vsyncpa [#allocation4], 0 }
   0xc   :  { %24 = vsyncpa [#allocation4 + $0x1], 0 }
   0xd   :  { %25 = vsyncpa [#allocation15], 0 }
   0xe   :  { %27 = vsyncpa [#allocation15 + $0x1], 0  ;;  %s1668_s13 = smov 0   ;;  %s1670_s14 = smov 0  }
   0xf   :  { %s1672_s15 = smov 0   ;;  %s1674_s16 = smov 0  }
  0x10   :  { %s1676_s17 = smov 0   ;;  %s1678_s18 = smov 0  }
  0x11 LB: > { %2036 = sst [smem:[#allocation23_spill]] %s1582_s15  ;;  %s1699_s19 = sadd.s32 4294967295, %s1594_s18   ;;  %s1594_s18 = sphi %s1678_s18, %s33_s18   ;;  %s1590_s17 = sphi %s1676_s17, %s2067_s17   ;;  %s1586_s16 = sphi %s1674_s16, %s2066_s16   ;;  %s1582_s15 = sphi %s1672_s15, %s2065_s15   ;;  %s1578_s14 = sphi %s1670_s14, %s2069_s14   ;;  %s1574_s13 = sphi %s1668_s13, %s2068_s13  }
  0x12   : > { %2037 = sst [smem:[#allocation24_spill]] %s1590_s17  ;;  %p1056_p0 = scmp.ge.s32.totalorder %s1594_s18, 1 }
  0x13   : > { %p2030_p1 = scmp.eq.s32.totalorder %s1699_s19, 0  ;;  %p319_p2 = scmp.lt.s32.totalorder %s1594_s18, 3 }
  0x14   : > { %s1596_s21 = smov [#allocation5]   ;;  %s1597_s24 = smov [#allocation8]  }
  0x15   : > { %p1704_p3 = pnand %p1056_p0, %p319_p2  ;;  %s334_s22 = sshll.u32 %s1596_s21, 4  ;;  %s335_s22 = int_to_ptr.vmem [resolvable:$true] %s334_s22 }
  0x16   : > { %s369_s25 = sshll.u32 %s1597_s24, 4  ;;  %s1299_s27 = scalar_lea.vmem %s335_s22, 256  ;;  %s370_s25 = int_to_ptr.vmem [resolvable:$true] %s369_s25 }
  0x17   : > { %p1175_p4 = pneg %p1704_p3  ;;  %p1300_p8 = scmp.ne.s32.totalorder %s335_s22, %s1299_s27 }
  0x18   : > { %p1307_p11 = scmp.lt.s32.totalorder %s335_s22, %s335_s22  ;;  %p1308_p12 = scmp.lt.s32.totalorder %s1299_s27, %s1299_s27 }
  0x19   : > { %p1713_p6 = pnand %p1175_p4, %p2030_p1 }
  0x1a   : > { %p1309_p13 = por %p1308_p12, %p1307_p11 }
  0x1b   : > { %p1719_p7 = pneg %p1713_p6 }
  0x1d   : > { %p1302_p9 = pnand %p1300_p8, %p1719_p7 }
  0x1f   : > { %p1303_p10 = pneg %p1302_p9 }
  0x21   : > { %p1310_p0 = pnand %p1309_p13, %p1303_p10 }
  0x23   : > { %1313 = shalt.err (!%p1310_p0)
}
  0x24   : > { %s2022_s28 = smov 128   ;;  %s2024_s29 = smov 8  }
  0x25   : > { %s2041_s1 = sld [smem:[#allocation27_spill]]  ;;  %s1325_s12 = scalar_lea.vmem %s370_s25, 256 }
  0x26   : > { %p1326_p2 = scmp.ne.s32.totalorder %s370_s25, %s1325_s12  ;;  %p1333_p9 = scmp.lt.s32.totalorder %s370_s25, %s370_s25 }
  0x27   : > { %p1334_p10 = scmp.lt.s32.totalorder %s1325_s12, %s1325_s12 }
  0x28   : > { %p1328_p4 = pnand %p1326_p2, %p1719_p7 }
  0x29   : > { %p1335_p11 = por %p1334_p10, %p1333_p9 }
  0x2a   : > { %p1329_p8 = pneg %p1328_p4 }
  0x2b   : > { %1178 = dma.hbm_to_vmem [thread:$0]  (!%p1713_p6), %s2041_s1, 256, %s335_s22, [#allocation6], %s2022_s28, %s2022_s28, %s2024_s29  }
  0x2c   : > { %p1336_p12 = pnand %p1335_p11, %p1329_p8 }
  0x2e   : > { %1339 = shalt.err (!%p1336_p12)
}
  0x2f   : > { %s1600_s21 = smov 64   ;;  %s1601_s24 = smov 4  }
  0x30   : > { %s2042_s5 = sld [smem:[#allocation29_spill]]  ;;  %s1602_s30 = smov [#allocation7]  }
  0x31   : > { %s350_s11 = sshll.u32 %s1602_s30, 4  ;;  %s1603_s28 = smov [#allocation10]   ;;  %s351_s11 = int_to_ptr.vmem [resolvable:$true] %s350_s11 }
  0x32   : > { %s382_s29 = sshll.u32 %s1603_s28, 4  ;;  %s1351_s12 = scalar_lea.vmem %s351_s11, 256  ;;  %s383_s29 = int_to_ptr.vmem [resolvable:$true] %s382_s29 }
  0x33   : > { %p1352_p13 = scmp.ne.s32.totalorder %s351_s11, %s1351_s12  ;;  %p1359_p4 = scmp.lt.s32.totalorder %s351_s11, %s351_s11 }
  0x34   : > { %p1360_p8 = scmp.lt.s32.totalorder %s1351_s12, %s1351_s12 }
  0x35   : > { %p1354_p0 = pnand %p1352_p13, %p1719_p7 }
  0x36   : > { %1184 = dma.hbm_to_vmem [thread:$0]  (!%p1713_p6), %s2042_s5, 256, %s370_s25, [#allocation9], %s1600_s21, %s1600_s21, %s1601_s24  }
  0x37   : > { %p1355_p2 = pneg %p1354_p0  ;;  %p1361_p9 = por %p1360_p8, %p1359_p4 }
  0x39   : > { %p1362_p10 = pnand %p1361_p9, %p1355_p2 }
  0x3b   : > { %1365 = shalt.err (!%p1362_p10)
}
  0x3c   : > { %s2043_s27 = smov 8   ;;  %s2044_s25 = smov 128  }
  0x3d   : > { %s2045_s2 = sld [smem:[#allocation28_spill]]  ;;  %s1377_s28 = scalar_lea.vmem %s383_s29, 256 }
  0x3e   : > { %p1378_p11 = scmp.ne.s32.totalorder %s383_s29, %s1377_s28  ;;  %p1385_p0 = scmp.lt.s32.totalorder %s383_s29, %s383_s29 }
  0x3f   : > { %p1386_p5 = scmp.lt.s32.totalorder %s1377_s28, %s1377_s28 }
  0x40   : > { %p1380_p12 = pnand %p1378_p11, %p1719_p7 }
  0x41   : > { %p1387_p4 = por %p1386_p5, %p1385_p0 }
  0x42   : > { %p1381_p13 = pneg %p1380_p12 }
  0x43   : > { %1181 = dma.hbm_to_vmem [thread:$0]  (!%p1713_p6), %s2045_s2, 256, %s351_s11, [#allocation6], %s2044_s25, %s2044_s25, %s2043_s27  }
  0x44   : > { %p1388_p2 = pnand %p1387_p4, %p1381_p13 }
  0x46   : > { %1391 = shalt.err (!%p1388_p2)
}
  0x47   : > { %s2046_s6 = sld [smem:[#allocation30_spill]]  ;;  %s1604_s11 = smov [#allocation11]  }
  0x48   : > { %s395_s22 = sshll.u32 %s1604_s11, 4  ;;  %s396_s22 = int_to_ptr.vmem [resolvable:$true] %s395_s22 }
  0x49   : > { %s1403_s30 = scalar_lea.vmem %s396_s22, 256  ;;  %p1411_p10 = scmp.lt.s32.totalorder %s396_s22, %s396_s22 }
  0x4a   : > { %p1404_p8 = scmp.ne.s32.totalorder %s396_s22, %s1403_s30  ;;  %p1412_p11 = scmp.lt.s32.totalorder %s1403_s30, %s1403_s30 }
  0x4c   : > { %p1406_p9 = pnand %p1404_p8, %p1719_p7  ;;  %p1413_p12 = por %p1412_p11, %p1411_p10 }
  0x4d   : > { %1187 = dma.hbm_to_vmem [thread:$0]  (!%p1713_p6), %s2046_s6, 256, %s383_s29, [#allocation9], %s1600_s21, %s1600_s21, %s1601_s24  }
  0x4e   : > { %p1407_p5 = pneg %p1406_p9 }
  0x50   : > { %p1414_p13 = pnand %p1413_p12, %p1407_p5 }
  0x52   : > { %1417 = shalt.err (!%p1414_p13)
}
  0x53   : > { %s2047_s7 = sld [smem:[#allocation31_spill]]  ;;  %s2026_s23 = sadd.s32 4294967294, %s1594_s18  }
  0x54   : > { %s45_s26 = sadd.s32 1, %s1590_s17  ;;  %s54_s28 = sadd.s32 1, %s1582_s15 }
  0x55   : > { %p47_p7 = scmp.ge.s32.totalorder %s45_s26, 2  ;;  %p61_p0 = scmp.ne.s32.totalorder %s1582_s15, %s1578_s14 }
  0x56   : > { %p62_p4 = scmp.eq.s32.totalorder %s1594_s18, 0  ;;  %p67_p2 = scmp.ne.s32.totalorder %s1578_s14, %s1574_s13 }
  0x57   : > { %s2071_s26 = smov (%p47_p7, %s45_s26), 0  ;;  %p250_p9 = scmp.eq.s32.totalorder %s1699_s19, 1 }
  0x58   : > { %2048 = sst [smem:[#allocation25_spill]] %s2071_s26  ;;  %p1783_p8 = por %p62_p4, %p61_p0 }
  0x59   : > { %1190 = dma.hbm_to_vmem [thread:$0]  (!%p1713_p6), %s2047_s7, 256, %s396_s22, [#allocation12], %s1600_s21, %s1600_s21, %s1601_s24  }
  0x5a   : > { %p1789_p6 = por %p2030_p1, %p67_p2  ;;  %s49_s24 = ssub.s32 %s1590_s17, %s2071_s26 }
  0x5b   : > { %p52_p5 = scmp.eq.s32.totalorder %s49_s24, 0  ;;  %p256_p10 = scmp.eq.s32.totalorder %s2026_s23, 1 }
  0x5c   : > { %p1798_p11 = por %p250_p9, %p61_p0  ;;  %p1210_p12 = scmp.lt.s32.totalorder %s1594_s18, 2 }
  0x5d   : > { %s1804_s22 = scalar_select %p52_p5, %s1582_s15, %s54_s28  }
  0x5e   : > { %p1806_p13 = por %p256_p10, %p67_p2  ;;  %s409_s1 = sand.u32 1, %s1582_s15  }
  0x5f   : > { %2052 = sst [smem:[#allocation26_spill]] %s1804_s22  ;;  %s1063_s29 = sshll.u32 %s409_s1, 4 }
  0x60   : > { %s2053_s30 = scalar_select %p1806_p13, 1, 0 }
  0x61   : > { %s1104_s2 = sshll.u32 %s1590_s17, 8  ;;  %s413_s7 = scalar_lea.vmem [#allocation2], %s1063_s29 }
  0x62   : > { %s421_s24 = scalar_lea.hbm %s2011_s0, %s1104_s2  ;;  %s422_s23 = sshll.u32 %s413_s7, 4  ;;  %s423_s23 = int_to_ptr.vmem [resolvable:$true] %s422_s23 }
  0x63   : > { %p1817_p7 = pnand %p1210_p12, %p1783_p8  ;;  %s410_s28 = scalar_lea.sflag [#allocation3], %s409_s1 }
  0x64   : > { %s1431_s22 = scalar_lea.vmem %s423_s23, 256  ;;  %s1605_s17 = smov [#allocation2]  }
  0x65   : > { %p1420_p0 = pneg %p1817_p7  ;;  %p1432_p4 = scmp.ne.s32.totalorder %s423_s23, %s1431_s22 }
  0x66   : > { %s1436_s15 = sshll.u32 %s1605_s17, 4  ;;  %s1437_s15 = int_to_ptr.vmem [resolvable:$false] %s1436_s15 }
  0x67   : > { %p1434_p2 = pnand %p1432_p4, %p1420_p0  ;;  %s1438_s2 = scalar_lea.vmem %s1437_s15, 512 }
  0x68   : > { %p1439_p5 = scmp.lt.s32.totalorder %s423_s23, %s1437_s15  ;;  %p1440_p10 = scmp.lt.s32.totalorder %s1438_s2, %s1431_s22 }
  0x69   : > { %p1435_p9 = pneg %p1434_p2 }
  0x6a   : > { %p1441_p1 = por %p1440_p10, %p1439_p5 }
  0x6c   : > { %p1442_p13 = pnand %p1441_p1, %p1435_p9 }
  0x6e   : > { %1445 = shalt.err (!%p1442_p13)
}
  0x6f   : > { %1194 = dma.hbm_to_vmem [thread:$0]  (!%p1817_p7), %s421_s24, 256, %s423_s23, %s410_s28, %s2044_s25, %s2044_s25, %s2043_s27  }
  0x70   : > { %434 = sbr.rel (%p1704_p3) target bundleno = 703 (0x2bf), region = 52  ;;  %s1831_s5 = sand.u32 (!%p1704_p3), 1, %s1578_s14  }
  0x71   : > { %s1067_s6 = sshll.u32 (!%p1704_p3), %s1831_s5, 4  ;;  %s437_s7 = scalar_lea.sflag (!%p1704_p3), [#allocation3], %s1831_s5 }
  0x72   : > { %s440_s15 = scalar_lea.vmem (!%p1704_p3), [#allocation2], %s1067_s6 }
  0x75   : > { %1549 = dma.done.wait (%p1789_p6), %s437_s7, 256  }
  0x76   : > { %1551 = vsyncadd (%p1789_p6), %s437_s7, 4294967040  ;;  %p2055_p1 = scmp.eq.s32.totalorder %s1699_s19, 0 }
  0x78   : > { %1553 = dma.done.wait (%p2055_p1), [#allocation6], 512   ;;  %p2056_p8 = pmov %p2055_p1 }
  0x79   : > { %p2057_p3 = pmov %p2055_p1 }
  0x7a   : > { %1555 = vsyncadd (%p2056_p8), [#allocation6], 4294966784 }
  0x7b   : > { %1557 = dma.done.wait (%p2057_p3), [#allocation9], 512   ;;  %p2058_p12 = pmov %p2055_p1 }
  0x7c   : > { %p2059_p13 = pmov %p2055_p1 }
  0x7d   : > { %1559 = vsyncadd (%p2058_p12), [#allocation9], 4294966784 }
  0x7e   : > { %1561 = dma.done.wait (%p2059_p13), [#allocation12], 256   ;;  %p2060_p7 = pmov %p2055_p1 }
  0x7f   : > { %vm518_vm0 = vcmask 261120   ;;  %v514_v0 = vld [vmem:[%s440_s15] sm:$0xff]  ;;  %v515_v1 = vld [vmem:[%s440_s15 + $0x8] sm:$0xff]  ;;  %v1606_v16 = vmov 0.0   ;;  %vm1607_vm1 = vmmov 0   ;;  %s1868_s23 = sshll.u32 %s1831_s5, 3 }
  0x80   : > { %1563 = vsyncadd (%p2060_p7), [#allocation12], 4294967040  ;;  %v519_v2 = vsel %vm518_vm0, %v514_v0, 0.0  ;;  %v522_v3 = vsel %vm518_vm0, %v515_v1, 0.0  ;;  %v1278_v14 = vld [vmem:[#allocation10 + $0x8] sm:$0xff]   ;;  %v1279_v15 = vld [vmem:[#allocation8 + $0x8] sm:$0xff]   ;;  %1131 = vmatprep.subr.bf16.mxu1 %v1606_v16  ;;  %1123 = vmatprep.subr.bf16.mxu0 %v1606_v16 }
  0x81   : > { %520 = vadd.xlane.f32.xlu0 %v519_v2  ;;  %1132 = vmatpush3.bf16.msra.mxu1 %v1278_v14  ;;  %v1280_v17 = vld [vmem:[#allocation10] sm:$0xff]   ;;  %v1281_v18 = vld [vmem:[#allocation8] sm:$0xff]   ;;  %v570_v36 = vld [vmem:[#allocation7 + $0x8] sm:$0xff]  ;;  %vm643_vm2 = vcmask 257024   ;;  %s499_s26 = scalar_lea.vmem [#allocation14], %s1868_s23  ;;  %s791_s21 = sand.u32 1, %s1699_s19  }
  0x82   : > { %1124 = vmatpush3.bf16.msra.mxu0 %v1279_v15  ;;  %1133 = vmatprep.subr.bf16.mxu1 %v1606_v16  ;;  %v1076_v26 = vld [vmem:[%s2014_s3] ss:$0 sm:$0xff]  ;;  %v569_v35 = vld [vmem:[#allocation7] sm:$0xff]  ;;  %v563_v37 = vld [vmem:[#allocation5 + $0x8] sm:$0xff]  ;;  %s830_s12 = sshll.u32 %s499_s26, 4  ;;  %s1873_s22 = sshll.u32 %s1586_s16, 7  ;;  %s1876_s12 = int_to_ptr.vmem [resolvable:$true] %s830_s12 }
  0x83   : > { %1125 = vmatprep.subr.bf16.mxu0 %v1606_v16  ;;  %1135 = vmatprep.mubr.msk.bf16.mxu1 %vm1607_vm1, %v1606_v16  ;;  %v1077_v28 = vld [vmem:[%s2015_s4] ss:$0 sm:$0xff]  ;;  %v1282_v46 = vld [vmem:[#allocation11 + $0x8] sm:$0xff]   ;;  %s1879_s1 = scalar_lea.vmem [#allocation13], %s1868_s23  ;;  %s1888_s24 = scalar_lea.hbm %s2020_s9, %s1873_s22 }
  0x84   : > { %1127 = vmatprep.mubr.msk.bf16.mxu0 %vm1607_vm1, %v1606_v16  ;;  %v562_v33 = vld [vmem:[#allocation5] sm:$0xff]  ;;  %s812_s29 = sshll.u32 %s1879_s1, 4  ;;  %s1897_s6 = scalar_lea.hbm %s2019_s8, %s1873_s22  ;;  %s1890_s29 = int_to_ptr.vmem [resolvable:$true] %s812_s29 }
  0x85   : > { %523 = vadd.xlane.f32.xlu0 %v522_v3  ;;  %1134 = vmatpush3.bf16.msra.mxu1 %v1280_v17  ;;  %v1283_v48 = vld [vmem:[#allocation11] sm:$0xff]   ;;  %s1899_s7 = scalar_lea.sflag [#allocation15], %s791_s21  ;;  %s1446_s15 = scalar_lea.vmem %s1876_s12, 128 }
  0x86   : > { %1126 = vmatpush3.bf16.msra.mxu0 %v1281_v18  ;;  %p1447_p6 = scmp.ne.s32.totalorder %s1876_s12, %s1446_s15  ;;  %s1608_s17 = smov [#allocation14]  }
  0x87   : > { %1139 = vmatprep.subr.bf16.mxu0 %v1606_v16  ;;  %s1450_s20 = sshll.u32 %s1608_s17, 4  ;;  %s1451_s20 = int_to_ptr.vmem [resolvable:$false] %s1450_s20 }
  0x88   : > { %p1448_p0 = pnand %p1447_p6, %p1798_p11  ;;  %s1452_s27 = scalar_lea.vmem %s1451_s20, 256 }
  0x89   : > { %p1453_p2 = scmp.lt.s32.totalorder %s1876_s12, %s1451_s20  ;;  %p1454_p9 = scmp.lt.s32.totalorder %s1452_s27, %s1446_s15 }
  0x8a   : > { %p1449_p4 = pneg %p1448_p0 }
  0x8b   : > { %p1455_p5 = por %p1454_p9, %p1453_p2 }
  0x8d   : > { %p1456_p10 = pnand %p1455_p5, %p1449_p4 }
 0x10a   : > { %v521_v4 = vpop.xlane.xlu0 %520 }
 0x10b   : > { %v526_v5 = vmul.f32 0.03125, %v521_v4 }
 0x10d   : > { %v528_v6 = vsub.f32 %v514_v0, %v526_v5 }
 0x10e   : > { %v524_v7 = vpop.xlane.xlu0 %523 }
 0x10f   : > { %v527_v8 = vmul.f32 0.03125, %v524_v7  ;;  %v530_v9 = vmul.f32 %v528_v6, %v528_v6 }
 0x111   : > { %v529_v10 = vsub.f32 %v515_v1, %v527_v8  ;;  %v532_v11 = vsel %vm518_vm0, %v530_v9, 0.0 }
 0x112   : > { %533 = vadd.xlane.f32.xlu1 %v532_v11 }
 0x113   : > { %v531_v12 = vmul.f32 %v529_v10, %v529_v10 }
 0x115   : > { %v535_v13 = vsel %vm518_vm0, %v531_v12, 0.0 }
 0x116   : > { %536 = vadd.xlane.f32.xlu1 %v535_v13 }
 0x19b   : > { %v534_v19 = vpop.xlane.xlu1 %533 }
 0x19c   : > { %v538_v20 = vmul.f32 0.03125, %v534_v19 }
 0x19e   : > { %v540_v21 = vadd.f32 1e-05, %v538_v20 }
 0x19f   : > { %v537_v22 = vpop.xlane.xlu1 %536 }
 0x1a0   : > { %1284 = vrsqrt.f32 %v540_v21  ;;  %v539_v23 = vmul.f32 0.03125, %v537_v22 }
 0x1a2   : > { %v541_v24 = vadd.f32 1e-05, %v539_v23 }
 0x1a4   : > { %1286 = vrsqrt.f32 %v541_v24 }
 0x1ad   : > { %v1285_v25 = vpop.eup %1284 }
 0x1ae   : > { %v544_v27 = vmul.f32 %v1285_v25, %v528_v6 }
 0x1b0   : > { %v552_v29 = vmul.f32 %v1076_v26, %v544_v27 }
 0x1b1   : > { %v1287_v30 = vpop.eup %1286 }
 0x1b2   : > { %v545_v31 = vmul.f32 %v1287_v30, %v529_v10  ;;  %v560_v32 = vadd.f32 %v1077_v28, %v552_v29 }
 0x1b4   : > { %v553_v34 = vmul.f32 %v1076_v26, %v545_v31  ;;  %v564_v39 = vadd.f32 %v562_v33, %v560_v32  ;;  %v571_v40 = vadd.f32 %v569_v35, %v560_v32 }
 0x1b6   : > { %v561_v38 = vadd.f32 %v1077_v28, %v553_v34  ;;  %v566_v44 = vmul.f32 0.35355338, %v564_v39 }
 0x1b8   : > { %v572_v41 = vadd.f32 %v570_v36, %v561_v38  ;;  %v565_v42 = vadd.f32 %v563_v37, %v561_v38  ;;  %v574_v49 = vpack.c.bf16 %v561_v38, %v560_v32 }
 0x1ba   : > { %v573_v43 = vpack.c.bf16 %v572_v41, %v571_v40  ;;  %v567_v45 = vmul.f32 0.35355338, %v565_v42 }
 0x1bc   : > { %1136 = vmatmul.mubr.msk.bf16.vlgmr.msra.gmra.mxu1 %vm518_vm0, %v573_v43  ;;  %v568_v47 = vpack.c.bf16 %v567_v45, %v566_v44 }
 0x1be   : > { %1128 = vmatmul.mubr.msk.bf16.vlgmr.msra.gmra.mxu0 %vm518_vm0, %v568_v47 }
 0x1bf   : > { %1140 = vmatpush3.bf16.msra.mxu0 %v1282_v46  ;;  %1143 = vmatprep.mubr.msk.bf16.mxu0 %vm1607_vm1, %v1606_v16 }
 0x1c0   : > { %1141 = vmatprep.subr.bf16.mxu0 %v1606_v16 }
 0x1c3   : > { %1142 = vmatpush3.bf16.msra.mxu0 %v1283_v48 }
 0x1c6   : > { %1144 = vmatmul.mubr.msk.bf16.vlgmr.msra.gmra.mxu0 %vm518_vm0, %v574_v49 }
 0x27c   : > { %v699_v50 = vpop.f32.mrf.mxu1 }
 0x27d   : > { %v1107_v51 = vpack.c.bf16 %v699_v50, %v699_v50 }
 0x27e   : > { %v628_v52 = vpop.f32.mrf.mxu0  ;;  %v1137_v53 = vpop.f32.mrf.mxu1 }
 0x27f   : > { %714 = vst.msk [vmem:[%s499_s26] sm:$0xf] %vm643_vm2, %v1107_v51  ;;  %v1105_v54 = vpack.c.bf16 %v628_v52, %v628_v52 }
 0x280   : > { %v1129_v55 = vpop.f32.mrf.mxu0  ;;  %v702_v56 = vpop.f32.mrf.mxu1 }
 0x281   : > { %644 = vst.msk [vmem:[%s1879_s1] sm:$0xf] %vm643_vm2, %v1105_v54  ;;  %v1108_v57 = vpack.c.bf16 %v702_v56, %v702_v56 }
 0x282   : > { %v631_v58 = vpop.f32.mrf.mxu0  ;;  %v1138_v59 = vpop.f32.mrf.mxu1 }
 0x283   : > { %715 = vst.msk [vmem:[%s499_s26 + $0x4] sm:$0xf] %vm643_vm2, %v1108_v57  ;;  %v1106_v60 = vpack.c.bf16 %v631_v58, %v631_v58 }
 0x284   : > { %v1130_v61 = vpop.f32.mrf.mxu0 }
 0x285   : > { %1459 = shalt.err (!%p1456_p10)
}
 0x286   : > { %s1460_s25 = scalar_lea.hbm %s1888_s24, 128  ;;  %s1464_s16 = scalar_lea.hbm %s2020_s9, 256 }
 0x287   : > { %p1461_p1 = scmp.ne.s32.totalorder %s1888_s24, %s1460_s25  ;;  %p1465_p12 = scmp.lt.s32.totalorder %s1888_s24, %s2020_s9 }
 0x288   : > { %p1466_p13 = scmp.lt.s32.totalorder %s1464_s16, %s1460_s25 }
 0x289   : > { %p1462_p8 = pnand %p1461_p1, %p1798_p11 }
 0x28a   : > { %p1467_p7 = por %p1466_p13, %p1465_p12 }
 0x28b   : > { %p1463_p3 = pneg %p1462_p8 }
 0x28d   : > { %p1468_p6 = pnand %p1467_p7, %p1463_p3 }
 0x28f   : > { %1471 = shalt.err (!%p1468_p6)
}
 0x290   : > { %s1609_s2 = smov 64   ;;  %s1610_s15 = smov 4   ;;  %645 = vst.msk [vmem:[%s1879_s1 + $0x4] sm:$0xf] %vm643_vm2, %v1106_v60  ;;  %v769_v62 = vpop.f32.mrf.mxu0 }
 0x291   : > { %1170 = dma.vmem_to_hbm [thread:$0]  (%p1798_p11), %s1876_s12, 128, %s1888_s24, %s1899_s7, %s1609_s2, %s1609_s2, %s1610_s15  }
 0x292   : > { %s787_s17 = scalar_lea.sflag [#allocation4], %s1831_s5  ;;  %s1472_s20 = scalar_lea.vmem %s1890_s29, 128 }
 0x293   : > { %p1473_p0 = scmp.ne.s32.totalorder %s1890_s29, %s1472_s20  ;;  %s1611_s27 = smov [#allocation13]  }
 0x294   : > { %s1476_s25 = sshll.u32 %s1611_s27, 4  ;;  %s1477_s25 = int_to_ptr.vmem [resolvable:$false] %s1476_s25 }
 0x295   : > { %p1474_p4 = pnand %p1473_p0, %p1798_p11  ;;  %s1478_s26 = scalar_lea.vmem %s1477_s25, 256 }
 0x296   : > { %p1479_p9 = scmp.lt.s32.totalorder %s1890_s29, %s1477_s25  ;;  %p1480_p5 = scmp.lt.s32.totalorder %s1478_s26, %s1472_s20 }
 0x297   : > { %p1475_p2 = pneg %p1474_p4 }
 0x298   : > { %p1481_p10 = por %p1480_p5, %p1479_p9 }
 0x29a   : > { %p1482_p1 = pnand %p1481_p10, %p1475_p2 }
 0x29c   : > { %1485 = shalt.err (!%p1482_p1)
}
 0x29d   : > { %s1486_s12 = scalar_lea.hbm %s1897_s6, 128  ;;  %s1490_s24 = scalar_lea.hbm %s2019_s8, 256 }
 0x29e   : > { %p1487_p8 = scmp.ne.s32.totalorder %s1897_s6, %s1486_s12  ;;  %p1491_p13 = scmp.lt.s32.totalorder %s1897_s6, %s2019_s8 }
 0x29f   : > { %p1492_p7 = scmp.lt.s32.totalorder %s1490_s24, %s1486_s12 }
 0x2a0   : > { %p1488_p3 = pnand %p1487_p8, %p1798_p11 }
 0x2a1   : > { %p1493_p6 = por %p1492_p7, %p1491_p13 }
 0x2a2   : > { %p1489_p12 = pneg %p1488_p3 }
 0x2a4   : > { %p1494_p0 = pnand %p1493_p6, %p1489_p12 }
 0x2a6   : > { %1497 = shalt.err (!%p1494_p0)
}
 0x2a7   : > { %1169 = dma.vmem_to_hbm [thread:$0]  (%p1798_p11), %s1890_s29, 128, %s1897_s6, %s787_s17, %s1609_s2, %s1609_s2, %s1610_s15   ;;  %v1109_v63 = vpack.c.bf16 %v769_v62, %v769_v62  ;;  %v1145_v0 = vpop.f32.mrf.mxu0 }
 0x2a8   : > { %s506_s19 = scalar_lea.vmem [#allocation16], %s1868_s23  ;;  %s1959_s25 = scalar_lea.hbm %s2021_s10, %s1873_s22 }
 0x2a9   : > { %s848_s28 = sshll.u32 %s506_s19, 4  ;;  %784 = vst.msk [vmem:[%s506_s19] sm:$0xf] %vm643_vm2, %v1109_v63  ;;  %v772_v1 = vpop.f32.mrf.mxu0  ;;  %s1612_s29 = smov [#allocation16]   ;;  %s1953_s28 = int_to_ptr.vmem [resolvable:$true] %s848_s28 }
 0x2aa   : > { %v1110_v2 = vpack.c.bf16 %v772_v1, %v772_v1  ;;  %s1498_s23 = scalar_lea.vmem %s1953_s28, 128  ;;  %s1502_s6 = sshll.u32 %s1612_s29, 4  ;;  %s1503_s6 = int_to_ptr.vmem [resolvable:$false] %s1502_s6 }
 0x2ab   : > { %v1146_v3 = vpop.f32.mrf.mxu0  ;;  %p1499_p4 = scmp.ne.s32.totalorder %s1953_s28, %s1498_s23  ;;  %s1504_s17 = scalar_lea.vmem %s1503_s6, 256 }
 0x2ac   : > { %785 = vst.msk [vmem:[%s506_s19 + $0x4] sm:$0xf] %vm643_vm2, %v1110_v2  ;;  %p1505_p5 = scmp.lt.s32.totalorder %s1953_s28, %s1503_s6  ;;  %p1506_p10 = scmp.lt.s32.totalorder %s1504_s17, %s1498_s23 }
 0x2ad   : > { %p1500_p2 = pnand %p1499_p4, %p1798_p11 }
 0x2ae   : > { %p1507_p1 = por %p1506_p10, %p1505_p5 }
 0x2af   : > { %p1501_p9 = pneg %p1500_p2 }
 0x2b1   : > { %p1508_p8 = pnand %p1507_p1, %p1501_p9 }
 0x2b3   : > { %1511 = shalt.err (!%p1508_p8)
}
 0x2b4   : > { %s1512_s22 = scalar_lea.hbm %s1959_s25, 128  ;;  %s1516_s5 = scalar_lea.hbm %s2021_s10, 256 }
 0x2b5   : > { %p1513_p3 = scmp.ne.s32.totalorder %s1959_s25, %s1512_s22  ;;  %p1517_p7 = scmp.lt.s32.totalorder %s1959_s25, %s2021_s10 }
 0x2b6   : > { %p1518_p6 = scmp.lt.s32.totalorder %s1516_s5, %s1512_s22 }
 0x2b7   : > { %p1514_p12 = pnand %p1513_p3, %p1798_p11 }
 0x2b8   : > { %p1519_p0 = por %p1518_p6, %p1517_p7 }
 0x2b9   : > { %p1515_p13 = pneg %p1514_p12 }
 0x2bb   : > { %p1520_p4 = pnand %p1519_p0, %p1515_p13 }
 0x2bd   : > { %1523 = shalt.err (!%p1520_p4)
}
 0x2be   : > { %1171 = dma.vmem_to_hbm [thread:$0]  (%p1798_p11), %s1953_s28, 128, %s1959_s25, %s1899_s7, %s1609_s2, %s1609_s2, %s1610_s15  }
 0x2bf PF: > { %s863_s21 = sand.u32 1, %s1574_s13   ;;  %p2061_p2 = scmp.ne.s32.totalorder %s2053_s30, 0 }
 0x2c0   : > { %p2062_p9 = scmp.ge.s32.totalorder %s1594_s18, 2  ;;  %s864_s16 = scalar_lea.sflag [#allocation4], %s863_s21 }
 0x2c2   : > { %p1196_p5 = pnand %p2062_p9, %p2061_p2 }
 0x2c4   : > { %p1197_p10 = pneg %p1196_p5 }
 0x2c6   : > { %1565 = dma.done.wait (%p1197_p10), %s864_s16, 128  }
 0x2c7   : > { %1567 = vsyncadd (%p1197_p10), %s864_s16, 4294967168  ;;  %s2063_s11 = sadd.s32 4294967294, %s1594_s18  }
 0x2c8   : > { %s872_s19 = sand.u32 1, %s2063_s11  }
 0x2c9   : > { %s873_s20 = scalar_lea.sflag [#allocation15], %s872_s19 }
 0x2ca   : > { %1569 = dma.done.wait (%p1197_p10), %s873_s20, 256  }
 0x2cb   : > { %1571 = vsyncadd (%p1197_p10), %s873_s20, 4294967040  ;;  %s33_s18 = sadd.s32 1, %s1594_s18   ;;  %s2064_s7 = sld [smem:[#allocation23_spill]] }
 0x2cc   : > { %p30_p11 = scmp.ge.s32.totalorder %s33_s18, 4   ;;  %s2065_s15 = sld [smem:[#allocation26_spill]] }
 0x2cd   : > { %s2066_s16 = sld [smem:[#allocation24_spill]]  ;;  %s2068_s13 = smov %s1578_s14 }
 0x2ce   : > { %s2067_s17 = sld [smem:[#allocation25_spill]]  ;;  %32 = sbr.rel (!%p30_p11) target bundleno = 17 (0x11), region = 151 }
 0x2d1   : > { %s2069_s14 = smov %s2064_s7 }
 0x2d3   :  { %887 = vsyncpa [#allocation3], 1 }
 0x2d4   :  { %889 = vsyncpa [#allocation3 + $0x1], 1 }
 0x2d5   :  { %890 = vsyncpa [#allocation6], 1 }
 0x2d6   :  { %891 = vsyncpa [#allocation9], 1 }
 0x2d7   :  { %892 = vsyncpa [#allocation12], 1 }
 0x2d8   :  { %893 = vsyncpa [#allocation4], 1 }
 0x2d9   :  { %895 = vsyncpa [#allocation4 + $0x1], 1 }
 0x2da   :  { %896 = vsyncpa [#allocation15], 1 }
 0x2db   :  { %898 = vsyncpa [#allocation15 + $0x1], 1 }

</bundles_post_ra>
